<compile_context>
chip_gen: v6e
topology: v6e:2x2x1
jax: 0.10.0
libtpu: 0.0.40
codegen_flags: <defaults>
</compile_context>

<pallas_src>
import functools

import jax
import jax.numpy as jnp
from jax.experimental import pallas as pl
from jax.experimental.pallas import tpu as pltpu


def _round_up(n, m):
    return (n + m - 1) // m * m


def _mlp_kernel(x_ref,
                w1_ref, b1_ref,
                w2_ref, b2_ref,
                w3_ref, b3_ref,
                w4_ref, b4_ref,
                w5_ref, b5_ref,
                o_ref):
    """Fused 5-layer MLP forward for one batch tile. Weights are VMEM-resident."""
    h = x_ref[...]

    def linear(h, w_ref, b_ref):
        return jnp.dot(h, w_ref[...], preferred_element_type=jnp.float32) + b_ref[...]

    h = jnp.maximum(linear(h, w1_ref, b1_ref), 0.0)   # LayerOne   + ReLU
    h = jnp.maximum(linear(h, w2_ref, b2_ref), 0.0)   # LayerTwo   + ReLU
    h = jnp.maximum(linear(h, w3_ref, b3_ref), 0.0)   # LayerThree + ReLU
    h = jnp.maximum(linear(h, w4_ref, b4_ref), 0.0)   # LayerFour  + ReLU
    h = linear(h, w5_ref, b5_ref)                     # LayerFive  (no activation)

    o_ref[...] = h.astype(o_ref.dtype)


@functools.partial(jax.jit, static_argnames=("tile_m",))
def neural_network_forward(x, params, *, tile_m=None):
    """Forward pass of NeuralNetwork.

    params: tuple (w1, b1, w2, b2, w3, b3, w4, b4, w5, b5).
    Weights wN: [in_features, out_features] (transposed vs torch's [out, in]).
    Biases  bN: [1, out_features] (broadcast over batch inside the kernel).
    """
    w1, b1, w2, b2, w3, b3, w4, b4, w5, b5 = params
    batch, inputs = x.shape
    hidden = w1.shape[1]
    outputs = w5.shape[1]

    # ---- lane-dense output path: pad last layer to a multiple of 128 cols ----
    out_pad = _round_up(outputs, 128)
    if out_pad != outputs:
        w5 = jnp.pad(w5, ((0, 0), (0, out_pad - outputs)))
        b5 = jnp.pad(b5, ((0, 0), (0, out_pad - outputs)))

    # ---- batch tiling: fill the MXU M dim when batch is large enough ----
    if tile_m is None:
        tile_m = min(256, _round_up(batch, 8))          # 256 fills v6e/v7x MXU
    padded_batch = _round_up(batch, tile_m)
    if padded_batch != batch:
        x = jnp.pad(x, ((0, padded_batch - batch), (0, 0)))

    grid = (padded_batch // tile_m,)

    # x / out: tiled over batch. Weights & biases: constant block -> resident.
    x_spec = pl.BlockSpec((tile_m, inputs), lambda i: (i, 0))
    const = lambda shape: pl.BlockSpec(shape, lambda i: (0, 0))
    param_list = (w1, b1, w2, b2, w3, b3, w4, b4, w5, b5)
    in_specs = [x_spec] + [const(p.shape) for p in param_list]
    out_spec = pl.BlockSpec((tile_m, out_pad), lambda i: (i, 0))

    flops = 2 * padded_batch * (inputs * hidden + 3 * hidden * hidden
                                + hidden * out_pad)
    bytes_accessed = 4 * (padded_batch * inputs
                          + sum(p.size for p in param_list)
                          + padded_batch * out_pad)

    out = pl.pallas_call(
        _mlp_kernel,
        out_shape=jax.ShapeDtypeStruct((padded_batch, out_pad), jnp.float32),
        grid=grid,
        in_specs=in_specs,
        out_specs=out_spec,
        compiler_params=pltpu.CompilerParams(
            dimension_semantics=("parallel",),        # v7x dual-TC sharding
            vmem_limit_bytes=32 * 1024 * 1024,        # safe on v5e/v6e/v7x
        ),
        cost_estimate=pl.CostEstimate(
            flops=flops, transcendentals=0, bytes_accessed=bytes_accessed),
    )(x, *param_list)

    # TODO(synk): for v6e/v7x, weights could be cast to bf16 (f32 accumulation
    # stays) to halve HBM traffic; kept f32 here to preserve 1e-4 tolerance.
    return out[:batch, :outputs]


def init_params(key, inputs, hidden, outputs):
    """Deterministic init mimicking torch.nn.Linear's U(-1/sqrt(fan_in), +...)."""
    dims = [(inputs, hidden), (hidden, hidden), (hidden, hidden),
            (hidden, hidden), (hidden, outputs)]
    params = []
    for (fan_in, fan_out) in dims:
        key, kw, kb = jax.random.split(key, 3)
        bound = 1.0 / (fan_in ** 0.5)
        w = jax.random.uniform(kw, (fan_in, fan_out), jnp.float32, -bound, bound)
        b = jax.random.uniform(kb, (1, fan_out), jnp.float32, -bound, bound)
        params += [w, b]
    return tuple(params)


def _reference_forward(x, params):
    """Plain-JAX reference for correctness check."""
    w1, b1, w2, b2, w3, b3, w4, b4, w5, b5 = params
    h = jnp.maximum(x @ w1 + b1, 0.0)
    h = jnp.maximum(h @ w2 + b2, 0.0)
    h = jnp.maximum(h @ w3 + b3, 0.0)
    h = jnp.maximum(h @ w4 + b4, 0.0)
    return h @ w5 + b5


if __name__ == "__main__":
    # Small shapes consistent with the module's forward (pure dense MLP).
    batch, inputs, hidden, outputs = 8, 32, 128, 16

    key = jax.random.PRNGKey(0)
    key, kx = jax.random.split(key)
    x = jax.random.normal(kx, (batch, inputs), jnp.float32)

    params = init_params(key, inputs, hidden, outputs)

    out = neural_network_forward(x, params)
    out = jax.block_until_ready(out)

    ref = _reference_forward(x, params)
    assert out.shape == (batch, outputs)
    assert jnp.allclose(out, ref, atol=1e-4, rtol=1e-4), "mismatch vs reference"

    print("KERNEL_OK")
</pallas_src>

<mosaic_0001>
module attributes {stable_mosaic.version = 11 : i64} {
  func.func @_mlp_kernel(%arg0: i32, %arg1: memref<8x32xf32, #tpu.memory_space<vmem>>, %arg2: memref<32x128xf32, #tpu.memory_space<vmem>>, %arg3: memref<1x128xf32, #tpu.memory_space<vmem>>, %arg4: memref<128x128xf32, #tpu.memory_space<vmem>>, %arg5: memref<1x128xf32, #tpu.memory_space<vmem>>, %arg6: memref<128x128xf32, #tpu.memory_space<vmem>>, %arg7: memref<1x128xf32, #tpu.memory_space<vmem>>, %arg8: memref<128x128xf32, #tpu.memory_space<vmem>>, %arg9: memref<1x128xf32, #tpu.memory_space<vmem>>, %arg10: memref<128x128xf32, #tpu.memory_space<vmem>>, %arg11: memref<1x128xf32, #tpu.memory_space<vmem>>, %arg12: memref<8x128xf32, #tpu.memory_space<vmem>>) attributes {dimension_semantics = [#tpu.dimension_semantics<parallel>], iteration_bounds = array<i64: 1>, scalar_prefetch = 0 : i64, scratch_operands = 0 : i64, tpu.core_type = #tpu.core_type<tc>, window_params = [{transform_indices = @transform_0, window_bounds = array<i64: 8, 32>}, {pipeline_mode = #tpu.pipeline_mode<synchronous>, transform_indices = @transform_1, window_bounds = array<i64: 32, 128>}, {pipeline_mode = #tpu.pipeline_mode<synchronous>, transform_indices = @transform_2, window_bounds = array<i64: 1, 128>}, {pipeline_mode = #tpu.pipeline_mode<synchronous>, transform_indices = @transform_3, window_bounds = array<i64: 128, 128>}, {pipeline_mode = #tpu.pipeline_mode<synchronous>, transform_indices = @transform_4, window_bounds = array<i64: 1, 128>}, {pipeline_mode = #tpu.pipeline_mode<synchronous>, transform_indices = @transform_5, window_bounds = array<i64: 128, 128>}, {pipeline_mode = #tpu.pipeline_mode<synchronous>, transform_indices = @transform_6, window_bounds = array<i64: 1, 128>}, {pipeline_mode = #tpu.pipeline_mode<synchronous>, transform_indices = @transform_7, window_bounds = array<i64: 128, 128>}, {pipeline_mode = #tpu.pipeline_mode<synchronous>, transform_indices = @transform_8, window_bounds = array<i64: 1, 128>}, {pipeline_mode = #tpu.pipeline_mode<synchronous>, transform_indices = @transform_9, window_bounds = array<i64: 128, 128>}, {pipeline_mode = #tpu.pipeline_mode<synchronous>, transform_indices = @transform_10, window_bounds = array<i64: 1, 128>}, {transform_indices = @transform_11, window_bounds = array<i64: 8, 128>}]} {
    %c0 = arith.constant 0 : index
    %c0_0 = arith.constant 0 : index
    %0 = vector.load %arg1[%c0, %c0_0] : memref<8x32xf32, #tpu.memory_space<vmem>>, vector<8x32xf32>
    %c0_1 = arith.constant 0 : index
    %c0_2 = arith.constant 0 : index
    %1 = vector.load %arg2[%c0_1, %c0_2] : memref<32x128xf32, #tpu.memory_space<vmem>>, vector<32x128xf32>
    %cst = arith.constant dense<0.000000e+00> : vector<8x128xf32>
    %2 = tpu.matmul %0, %1, %cst {dimension_numbers = #tpu.dot_dimension_numbers<[1], [0], [0], [1], [0, 0, 1, 1], [], []>} : vector<8x32xf32>, vector<32x128xf32>, vector<8x128xf32> -> vector<8x128xf32>
    %c0_3 = arith.constant 0 : index
    %c0_4 = arith.constant 0 : index
    %3 = vector.load %arg3[%c0_3, %c0_4] : memref<1x128xf32, #tpu.memory_space<vmem>>, vector<1x128xf32>
    %4 = vector.broadcast %3 : vector<1x128xf32> to vector<8x128xf32>
    %5 = arith.addf %2, %4 : vector<8x128xf32>
    %cst_5 = arith.constant 0.000000e+00 : f32
    %6 = vector.broadcast %cst_5 : f32 to vector<8x128xf32>
    %7 = arith.maximumf %5, %6 : vector<8x128xf32>
    %c0_6 = arith.constant 0 : index
    %c0_7 = arith.constant 0 : index
    %8 = vector.load %arg4[%c0_6, %c0_7] : memref<128x128xf32, #tpu.memory_space<vmem>>, vector<128x128xf32>
    %cst_8 = arith.constant dense<0.000000e+00> : vector<8x128xf32>
    %9 = tpu.matmul %7, %8, %cst_8 {dimension_numbers = #tpu.dot_dimension_numbers<[1], [0], [0], [1], [0, 0, 1, 1], [], []>} : vector<8x128xf32>, vector<128x128xf32>, vector<8x128xf32> -> vector<8x128xf32>
    %c0_9 = arith.constant 0 : index
    %c0_10 = arith.constant 0 : index
    %10 = vector.load %arg5[%c0_9, %c0_10] : memref<1x128xf32, #tpu.memory_space<vmem>>, vector<1x128xf32>
    %11 = vector.broadcast %10 : vector<1x128xf32> to vector<8x128xf32>
    %12 = arith.addf %9, %11 : vector<8x128xf32>
    %cst_11 = arith.constant 0.000000e+00 : f32
    %13 = vector.broadcast %cst_11 : f32 to vector<8x128xf32>
    %14 = arith.maximumf %12, %13 : vector<8x128xf32>
    %c0_12 = arith.constant 0 : index
    %c0_13 = arith.constant 0 : index
    %15 = vector.load %arg6[%c0_12, %c0_13] : memref<128x128xf32, #tpu.memory_space<vmem>>, vector<128x128xf32>
    %cst_14 = arith.constant dense<0.000000e+00> : vector<8x128xf32>
    %16 = tpu.matmul %14, %15, %cst_14 {dimension_numbers = #tpu.dot_dimension_numbers<[1], [0], [0], [1], [0, 0, 1, 1], [], []>} : vector<8x128xf32>, vector<128x128xf32>, vector<8x128xf32> -> vector<8x128xf32>
    %c0_15 = arith.constant 0 : index
    %c0_16 = arith.constant 0 : index
    %17 = vector.load %arg7[%c0_15, %c0_16] : memref<1x128xf32, #tpu.memory_space<vmem>>, vector<1x128xf32>
    %18 = vector.broadcast %17 : vector<1x128xf32> to vector<8x128xf32>
    %19 = arith.addf %16, %18 : vector<8x128xf32>
    %cst_17 = arith.constant 0.000000e+00 : f32
    %20 = vector.broadcast %cst_17 : f32 to vector<8x128xf32>
    %21 = arith.maximumf %19, %20 : vector<8x128xf32>
    %c0_18 = arith.constant 0 : index
    %c0_19 = arith.constant 0 : index
    %22 = vector.load %arg8[%c0_18, %c0_19] : memref<128x128xf32, #tpu.memory_space<vmem>>, vector<128x128xf32>
    %cst_20 = arith.constant dense<0.000000e+00> : vector<8x128xf32>
    %23 = tpu.matmul %21, %22, %cst_20 {dimension_numbers = #tpu.dot_dimension_numbers<[1], [0], [0], [1], [0, 0, 1, 1], [], []>} : vector<8x128xf32>, vector<128x128xf32>, vector<8x128xf32> -> vector<8x128xf32>
    %c0_21 = arith.constant 0 : index
    %c0_22 = arith.constant 0 : index
    %24 = vector.load %arg9[%c0_21, %c0_22] : memref<1x128xf32, #tpu.memory_space<vmem>>, vector<1x128xf32>
    %25 = vector.broadcast %24 : vector<1x128xf32> to vector<8x128xf32>
    %26 = arith.addf %23, %25 : vector<8x128xf32>
    %cst_23 = arith.constant 0.000000e+00 : f32
    %27 = vector.broadcast %cst_23 : f32 to vector<8x128xf32>
    %28 = arith.maximumf %26, %27 : vector<8x128xf32>
    %c0_24 = arith.constant 0 : index
    %c0_25 = arith.constant 0 : index
    %29 = vector.load %arg10[%c0_24, %c0_25] : memref<128x128xf32, #tpu.memory_space<vmem>>, vector<128x128xf32>
    %cst_26 = arith.constant dense<0.000000e+00> : vector<8x128xf32>
    %30 = tpu.matmul %28, %29, %cst_26 {dimension_numbers = #tpu.dot_dimension_numbers<[1], [0], [0], [1], [0, 0, 1, 1], [], []>} : vector<8x128xf32>, vector<128x128xf32>, vector<8x128xf32> -> vector<8x128xf32>
    %c0_27 = arith.constant 0 : index
    %c0_28 = arith.constant 0 : index
    %31 = vector.load %arg11[%c0_27, %c0_28] : memref<1x128xf32, #tpu.memory_space<vmem>>, vector<1x128xf32>
    %32 = vector.broadcast %31 : vector<1x128xf32> to vector<8x128xf32>
    %33 = arith.addf %30, %32 : vector<8x128xf32>
    %c0_29 = arith.constant 0 : index
    %c0_30 = arith.constant 0 : index
    %34 = vector.load %arg12[%c0_29, %c0_30] : memref<8x128xf32, #tpu.memory_space<vmem>>, vector<8x128xf32>
    tpu.vector_store %arg12[%c0_29, %c0_30], %33 {strides = array<i32>} : memref<8x128xf32, #tpu.memory_space<vmem>>, vector<8x128xf32>,
    return
  }
  func.func @transform_0(%arg0: i32) -> (i32, i32) {
    %c0_i32 = arith.constant 0 : i32
    %c0_i32_0 = arith.constant 0 : i32
    return %arg0, %c0_i32 : i32, i32
  }
  func.func @transform_1(%arg0: i32) -> (i32, i32) {
    %c0_i32 = arith.constant 0 : i32
    %c0_i32_0 = arith.constant 0 : i32
    %c0_i32_1 = arith.constant 0 : i32
    return %c0_i32, %c0_i32_0 : i32, i32
  }
  func.func @transform_2(%arg0: i32) -> (i32, i32) {
    %c0_i32 = arith.constant 0 : i32
    %c0_i32_0 = arith.constant 0 : i32
    %c0_i32_1 = arith.constant 0 : i32
    return %c0_i32, %c0_i32_0 : i32, i32
  }
  func.func @transform_3(%arg0: i32) -> (i32, i32) {
    %c0_i32 = arith.constant 0 : i32
    %c0_i32_0 = arith.constant 0 : i32
    %c0_i32_1 = arith.constant 0 : i32
    return %c0_i32, %c0_i32_0 : i32, i32
  }
  func.func @transform_4(%arg0: i32) -> (i32, i32) {
    %c0_i32 = arith.constant 0 : i32
    %c0_i32_0 = arith.constant 0 : i32
    %c0_i32_1 = arith.constant 0 : i32
    return %c0_i32, %c0_i32_0 : i32, i32
  }
  func.func @transform_5(%arg0: i32) -> (i32, i32) {
    %c0_i32 = arith.constant 0 : i32
    %c0_i32_0 = arith.constant 0 : i32
    %c0_i32_1 = arith.constant 0 : i32
    return %c0_i32, %c0_i32_0 : i32, i32
  }
  func.func @transform_6(%arg0: i32) -> (i32, i32) {
    %c0_i32 = arith.constant 0 : i32
    %c0_i32_0 = arith.constant 0 : i32
    %c0_i32_1 = arith.constant 0 : i32
    return %c0_i32, %c0_i32_0 : i32, i32
  }
  func.func @transform_7(%arg0: i32) -> (i32, i32) {
    %c0_i32 = arith.constant 0 : i32
    %c0_i32_0 = arith.constant 0 : i32
    %c0_i32_1 = arith.constant 0 : i32
    return %c0_i32, %c0_i32_0 : i32, i32
  }
  func.func @transform_8(%arg0: i32) -> (i32, i32) {
    %c0_i32 = arith.constant 0 : i32
    %c0_i32_0 = arith.constant 0 : i32
    %c0_i32_1 = arith.constant 0 : i32
    return %c0_i32, %c0_i32_0 : i32, i32
  }
  func.func @transform_9(%arg0: i32) -> (i32, i32) {
    %c0_i32 = arith.constant 0 : i32
    %c0_i32_0 = arith.constant 0 : i32
    %c0_i32_1 = arith.constant 0 : i32
    return %c0_i32, %c0_i32_0 : i32, i32
  }
  func.func @transform_10(%arg0: i32) -> (i32, i32) {
    %c0_i32 = arith.constant 0 : i32
    %c0_i32_0 = arith.constant 0 : i32
    %c0_i32_1 = arith.constant 0 : i32
    return %c0_i32, %c0_i32_0 : i32, i32
  }
  func.func @transform_11(%arg0: i32) -> (i32, i32) {
    %c0_i32 = arith.constant 0 : i32
    %c0_i32_0 = arith.constant 0 : i32
    return %arg0, %c0_i32 : i32, i32
  }
}

</mosaic_0001>

<bundles_post_ra>
// kernel: neural_network_forward.1
= control target key start
LH: loop header
LB: loop body
LE: loop exit
PB: predicated region body
PF: predicated region fallthrough
CT: control target
= control target key end

     0   :  { %16 = vsyncpa [#allocation3], 0  ;;  %s1171_s0 = inlined_call_operand.vmem [shape: f32[8,32], index: 0, kind: input, shape index: {}]   ;;  %s1172_s1 = inlined_call_operand.hbm [shape: f32[32,128], index: 1, kind: input, shape index: {}]   ;;  %s1173_s2 = inlined_call_operand.vmem [shape: f32[1,128], index: 2, kind: input, shape index: {}]   ;;  %s1174_s3 = inlined_call_operand.vmem [shape: f32[128,128], index: 3, kind: input, shape index: {}]   ;;  %s1175_s4 = inlined_call_operand.vmem [shape: f32[1,128], index: 4, kind: input, shape index: {}]   ;;  %s1176_s5 = inlined_call_operand.vmem [shape: f32[128,128], index: 5, kind: input, shape index: {}]   ;;  %s1177_s6 = inlined_call_operand.vmem [shape: f32[1,128], index: 6, kind: input, shape index: {}]   ;;  %s1178_s7 = inlined_call_operand.vmem [shape: f32[128,128], index: 7, kind: input, shape index: {}]   ;;  %s1179_s8 = inlined_call_operand.vmem [shape: f32[1,128], index: 8, kind: input, shape index: {}]   ;;  %s1180_s9 = inlined_call_operand.vmem [shape: f32[128,128], index: 9, kind: input, shape index: {}]   ;;  %s1181_s10 = inlined_call_operand.vmem [shape: f32[1,128], index: 10, kind: input, shape index: {}]   ;;  %s1182_s11 = inlined_call_operand.hbm [shape: f32[8,128], index: 11, kind: output, shape index: {}]  }
   0x1   :  { %17 = vsyncpa [#allocation4], 0  ;;  %s811_s17 = smov [#allocation2]  }
   0x2   :  { %s25_s18 = sshll.u32 %s811_s17, 4  ;;  %s26_s18 = int_to_ptr.vmem [resolvable:$true] %s25_s18 }
   0x3   :  { %s775_s19 = scalar_lea.vmem %s26_s18, 512  ;;  %p780_p1 = scmp.lt.s32.totalorder %s26_s18, %s26_s18 }
   0x4   :  { %p776_p0 = scmp.ne.s32.totalorder %s26_s18, %s775_s19  ;;  %p781_p2 = scmp.lt.s32.totalorder %s775_s19, %s775_s19 }
   0x6   :  { %p782_p3 = por %p781_p2, %p780_p1 }
   0x8   :  { %p783_p4 = pnand %p782_p3, %p776_p0 }
   0xa   :  { %786 = shalt.err (!%p783_p4)
}
   0xb   :  { %s812_s20 = smov 128   ;;  %s813_s21 = smov 8  }
   0xc   :  { %31 = dma.hbm_to_vmem [thread:$0]  %s1172_s1, 512, %s26_s18, [#allocation3], %s812_s20, %s812_s20, %s813_s21  }
   0xd   :  { %807 = dma.done.wait [#allocation3], 512  }
   0xe   :  { %808 = vsyncadd [#allocation3], 4294966784  ;;  %v814_v0 = vmov 0.0   ;;  %vm815_vm0 = vmmov 0   ;;  %v57_v1 = vld [vmem:[#allocation2 + $0x18] sm:$0xff]  ;;  %v56_v2 = vld [vmem:[#allocation2 + $0x10] sm:$0xff] }
   0xf   :  { %610 = vmatprep.subr.mxu0 %v814_v0  ;;  %618 = vmatprep.mubr.msk.f32.mxu0 %vm815_vm0, %v814_v0  ;;  %v155_v3 = vld [vmem:[%s1174_s3 + $0x78] sm:$0xff]  ;;  %v55_v4 = vld [vmem:[#allocation2 + $0x8] sm:$0xff]  ;;  %v154_v5 = vld [vmem:[%s1174_s3 + $0x70] sm:$0xff]  ;;  %vm65_vm1 = vcmask 261120   ;;  %s816_s22 = smov [#allocation5]  }
  0x10   :  { %621 = vmatprep.subr.mxu1 %v814_v0  ;;  %653 = vmatprep.mubr.msk.f32.mxu1 %vm815_vm0, %v814_v0  ;;  %v153_v6 = vld [vmem:[%s1174_s3 + $0x68] sm:$0xff]  ;;  %v54_v7 = vld [vmem:[#allocation2] sm:$0xff]  ;;  %v151_v10 = vld [vmem:[%s1174_s3 + $0x58] sm:$0xff]  ;;  %s522_s23 = sshll.u32 %s816_s22, 4  ;;  %s523_s23 = int_to_ptr.vmem [resolvable:$true] %s522_s23 }
  0x11   :  { %611 = vmatpush3.msra.mxu0 %v57_v1  ;;  %622 = vmatpush3.msra.mxu1 %v155_v3  ;;  %v53_v8 = vld [vmem:[%s1171_s0] sm:$0xff]  ;;  %v150_v11 = vld [vmem:[%s1174_s3 + $0x50] sm:$0xff]  ;;  %v149_v12 = vld [vmem:[%s1174_s3 + $0x48] sm:$0xff]  ;;  %p792_p6 = scmp.lt.s32.totalorder %s523_s23, %s523_s23 }
  0x12   :  { %612 = vmatprep.subr.mxu0 %v814_v0  ;;  %623 = vmatprep.subr.mxu1 %v814_v0  ;;  %v152_v9 = vld [vmem:[%s1174_s3 + $0x60] sm:$0xff]  ;;  %v147_v14 = vld [vmem:[%s1174_s3 + $0x38] sm:$0xff]  ;;  %v146_v15 = vld [vmem:[%s1174_s3 + $0x30] sm:$0xff] }
  0x13   :  { %613 = vmatpush3.msra.mxu0 %v56_v2  ;;  %624 = vmatpush3.msra.mxu1 %v154_v5  ;;  %v148_v13 = vld [vmem:[%s1174_s3 + $0x40] sm:$0xff]  ;;  %v145_v16 = vld [vmem:[%s1174_s3 + $0x28] sm:$0xff]  ;;  %v143_v18 = vld [vmem:[%s1174_s3 + $0x18] sm:$0xff] }
  0x14   :  { %614 = vmatprep.subr.mxu0 %v814_v0  ;;  %625 = vmatprep.subr.mxu1 %v814_v0  ;;  %v144_v17 = vld [vmem:[%s1174_s3 + $0x20] sm:$0xff]  ;;  %v142_v19 = vld [vmem:[%s1174_s3 + $0x10] sm:$0xff]  ;;  %v141_v20 = vld [vmem:[%s1174_s3 + $0x8] sm:$0xff] }
  0x15   :  { %615 = vmatpush3.msra.mxu0 %v55_v4  ;;  %626 = vmatpush3.msra.mxu1 %v153_v6  ;;  %v140_v21 = vld [vmem:[%s1174_s3] sm:$0xff]  ;;  %v249_v22 = vld [vmem:[%s1176_s5 + $0x78] sm:$0xff]  ;;  %v248_v23 = vld [vmem:[%s1176_s5 + $0x70] sm:$0xff] }
  0x16   :  { %616 = vmatprep.subr.mxu0 %v814_v0  ;;  %627 = vmatprep.subr.mxu1 %v814_v0  ;;  %v247_v24 = vld [vmem:[%s1176_s5 + $0x68] sm:$0xff]  ;;  %v246_v25 = vld [vmem:[%s1176_s5 + $0x60] sm:$0xff]  ;;  %v245_v26 = vld [vmem:[%s1176_s5 + $0x58] sm:$0xff] }
  0x17   :  { %617 = vmatpush3.msra.mxu0 %v54_v7  ;;  %628 = vmatpush3.msra.mxu1 %v152_v9  ;;  %v244_v27 = vld [vmem:[%s1176_s5 + $0x50] sm:$0xff]  ;;  %v243_v28 = vld [vmem:[%s1176_s5 + $0x48] sm:$0xff]  ;;  %v242_v29 = vld [vmem:[%s1176_s5 + $0x40] sm:$0xff] }
  0x18   :  { %619 = vmatmul.mubr.msk.f32.vlgmr.msra.gmra.mxu0 %vm65_vm1, %v53_v8  ;;  %629 = vmatprep.subr.mxu1 %v814_v0  ;;  %v241_v30 = vld [vmem:[%s1176_s5 + $0x38] sm:$0xff]  ;;  %v240_v31 = vld [vmem:[%s1176_s5 + $0x30] sm:$0xff]  ;;  %v239_v32 = vld [vmem:[%s1176_s5 + $0x28] sm:$0xff] }
  0x19   :  { %656 = vmatprep.subr.mxu0 %v814_v0  ;;  %630 = vmatpush3.msra.mxu1 %v151_v10  ;;  %v238_v33 = vld [vmem:[%s1176_s5 + $0x20] sm:$0xff]  ;;  %v237_v34 = vld [vmem:[%s1176_s5 + $0x18] sm:$0xff]  ;;  %v236_v40 = vld [vmem:[%s1176_s5 + $0x10] sm:$0xff] }
  0x1a   :  { %688 = vmatprep.mubr.msk.f32.mxu0 %vm815_vm0, %v814_v0  ;;  %631 = vmatprep.subr.mxu1 %v814_v0  ;;  %v531_v35 = vld [vmem:[%s1173_s2] ss:$0 sm:$0xff]  ;;  %v235_v41 = vld [vmem:[%s1176_s5 + $0x8] sm:$0xff]  ;;  %v343_v43 = vld [vmem:[%s1178_s7 + $0x78] sm:$0xff] }
  0x1b   :  { %632 = vmatpush3.msra.mxu1 %v150_v11  ;;  %657 = vmatpush3.msra.mxu0 %v249_v22  ;;  %v234_v42 = vld [vmem:[%s1176_s5] sm:$0xff]  ;;  %v342_v44 = vld [vmem:[%s1178_s7 + $0x70] sm:$0xff]  ;;  %v341_v45 = vld [vmem:[%s1178_s7 + $0x68] sm:$0xff] }
  0x1c   :  { %633 = vmatprep.subr.mxu1 %v814_v0  ;;  %658 = vmatprep.subr.mxu0 %v814_v0  ;;  %v340_v46 = vld [vmem:[%s1178_s7 + $0x60] sm:$0xff]  ;;  %v339_v47 = vld [vmem:[%s1178_s7 + $0x58] sm:$0xff]  ;;  %v338_v48 = vld [vmem:[%s1178_s7 + $0x50] sm:$0xff] }
  0x1d   :  { %634 = vmatpush3.msra.mxu1 %v149_v12  ;;  %659 = vmatpush3.msra.mxu0 %v248_v23  ;;  %v337_v49 = vld [vmem:[%s1178_s7 + $0x48] sm:$0xff]  ;;  %v336_v50 = vld [vmem:[%s1178_s7 + $0x40] sm:$0xff]  ;;  %v335_v51 = vld [vmem:[%s1178_s7 + $0x38] sm:$0xff] }
  0x1e   :  { %635 = vmatprep.subr.mxu1 %v814_v0  ;;  %660 = vmatprep.subr.mxu0 %v814_v0  ;;  %v334_v52 = vld [vmem:[%s1178_s7 + $0x30] sm:$0xff]  ;;  %v333_v53 = vld [vmem:[%s1178_s7 + $0x28] sm:$0xff]  ;;  %v332_v54 = vld [vmem:[%s1178_s7 + $0x20] sm:$0xff] }
  0x1f   :  { %636 = vmatpush3.msra.mxu1 %v148_v13  ;;  %661 = vmatpush3.msra.mxu0 %v247_v24  ;;  %v331_v55 = vld [vmem:[%s1178_s7 + $0x18] sm:$0xff]  ;;  %v533_v56 = vld [vmem:[%s1175_s4] ss:$0 sm:$0xff]  ;;  %v330_v61 = vld [vmem:[%s1178_s7 + $0x10] sm:$0xff] }
  0x20   :  { %637 = vmatprep.subr.mxu1 %v814_v0  ;;  %662 = vmatprep.subr.mxu0 %v814_v0  ;;  %v329_v62 = vld [vmem:[%s1178_s7 + $0x8] sm:$0xff]  ;;  %v328_v63 = vld [vmem:[%s1178_s7] sm:$0xff]  ;;  %v437_v1 = vld [vmem:[%s1180_s9 + $0x78] sm:$0xff] }
  0x21   :  { %638 = vmatpush3.msra.mxu1 %v147_v14  ;;  %663 = vmatpush3.msra.mxu0 %v246_v25  ;;  %v436_v2 = vld [vmem:[%s1180_s9 + $0x70] sm:$0xff]  ;;  %v435_v3 = vld [vmem:[%s1180_s9 + $0x68] sm:$0xff]  ;;  %v434_v4 = vld [vmem:[%s1180_s9 + $0x60] sm:$0xff] }
  0x22   :  { %639 = vmatprep.subr.mxu1 %v814_v0  ;;  %664 = vmatprep.subr.mxu0 %v814_v0  ;;  %v433_v5 = vld [vmem:[%s1180_s9 + $0x58] sm:$0xff]  ;;  %v432_v6 = vld [vmem:[%s1180_s9 + $0x50] sm:$0xff]  ;;  %v431_v7 = vld [vmem:[%s1180_s9 + $0x48] sm:$0xff] }
  0x23   :  { %640 = vmatpush3.msra.mxu1 %v146_v15  ;;  %665 = vmatpush3.msra.mxu0 %v245_v26  ;;  %v430_v8 = vld [vmem:[%s1180_s9 + $0x40] sm:$0xff]  ;;  %v429_v9 = vld [vmem:[%s1180_s9 + $0x38] sm:$0xff]  ;;  %v428_v10 = vld [vmem:[%s1180_s9 + $0x30] sm:$0xff] }
  0x24   :  { %641 = vmatprep.subr.mxu1 %v814_v0  ;;  %666 = vmatprep.subr.mxu0 %v814_v0  ;;  %v427_v11 = vld [vmem:[%s1180_s9 + $0x28] sm:$0xff]  ;;  %v426_v12 = vld [vmem:[%s1180_s9 + $0x20] sm:$0xff]  ;;  %v425_v13 = vld [vmem:[%s1180_s9 + $0x18] sm:$0xff] }
  0x25   :  { %642 = vmatpush3.msra.mxu1 %v145_v16  ;;  %667 = vmatpush3.msra.mxu0 %v244_v27  ;;  %v534_v14 = vld [vmem:[%s1177_s6] ss:$0 sm:$0xff] }
  0x26   :  { %643 = vmatprep.subr.mxu1 %v814_v0  ;;  %668 = vmatprep.subr.mxu0 %v814_v0  ;;  %v535_v22 = vld [vmem:[%s1179_s8] ss:$0 sm:$0xff] }
  0x27   :  { %644 = vmatpush3.msra.mxu1 %v144_v17  ;;  %669 = vmatpush3.msra.mxu0 %v243_v28  ;;  %v536_v27 = vld [vmem:[%s1181_s10] ss:$0 sm:$0xff] }
  0x28   :  { %645 = vmatprep.subr.mxu1 %v814_v0  ;;  %670 = vmatprep.subr.mxu0 %v814_v0 }
  0x29   :  { %646 = vmatpush3.msra.mxu1 %v143_v18  ;;  %671 = vmatpush3.msra.mxu0 %v242_v29 }
  0x2a   :  { %647 = vmatprep.subr.mxu1 %v814_v0  ;;  %672 = vmatprep.subr.mxu0 %v814_v0 }
  0x2b   :  { %648 = vmatpush3.msra.mxu1 %v142_v19  ;;  %673 = vmatpush3.msra.mxu0 %v241_v30  ;;  %v424_v19 = vld [vmem:[%s1180_s9 + $0x10] sm:$0xff] }
  0x2c   :  { %649 = vmatprep.subr.mxu1 %v814_v0  ;;  %674 = vmatprep.subr.mxu0 %v814_v0 }
  0x2d   :  { %650 = vmatpush3.msra.mxu1 %v141_v20  ;;  %675 = vmatpush3.msra.mxu0 %v240_v31  ;;  %v423_v20 = vld [vmem:[%s1180_s9 + $0x8] sm:$0xff] }
  0x2e   :  { %651 = vmatprep.subr.mxu1 %v814_v0  ;;  %676 = vmatprep.subr.mxu0 %v814_v0 }
  0x2f   :  { %652 = vmatpush3.msra.mxu1 %v140_v21  ;;  %677 = vmatpush3.msra.mxu0 %v239_v32  ;;  %v422_v21 = vld [vmem:[%s1180_s9] sm:$0xff]  ;;  %s787_s9 = scalar_lea.vmem %s523_s23, 128 }
  0x30   :  { %691 = vmatprep.subr.mxu1 %v814_v0  ;;  %678 = vmatprep.subr.mxu0 %v814_v0  ;;  %p788_p5 = scmp.ne.s32.totalorder %s523_s23, %s787_s9  ;;  %p793_p7 = scmp.lt.s32.totalorder %s787_s9, %s787_s9 }
  0x31   :  { %679 = vmatpush3.msra.mxu0 %v238_v33 }
  0x32   :  { %680 = vmatprep.subr.mxu0 %v814_v0  ;;  %p794_p8 = por %p793_p7, %p792_p6 }
  0x33   :  { %681 = vmatpush3.msra.mxu0 %v237_v34 }
  0x34   :  { %682 = vmatprep.subr.mxu0 %v814_v0  ;;  %p795_p9 = pnand %p794_p8, %p788_p5 }
  0x35   :  { %683 = vmatpush3.msra.mxu0 %v236_v40 }
  0x36   :  { %684 = vmatprep.subr.mxu0 %v814_v0 }
  0x37   :  { %685 = vmatpush3.msra.mxu0 %v235_v41 }
  0x38   :  { %686 = vmatprep.subr.mxu0 %v814_v0 }
  0x39   :  { %687 = vmatpush3.msra.mxu0 %v234_v42 }
  0x3a   :  { %726 = vmatprep.subr.mxu0 %v814_v0 }
  0xd8   :  { %v135_v36 = vpop.f32.mrf.mxu0 }
  0xd9   :  { %v136_v37 = vadd.f32 %v531_v35, %v135_v36 }
  0xda   :  { %v620_v38 = vpop.f32.mrf.mxu0 }
  0xdb   :  { %v139_v39 = vmax.f32 %v136_v37, 0.0 }
  0xdd   :  { %654 = vmatmul.mubr.f32.vlgmr.msra.gmra.mxu1 %v139_v39 }
  0xde   :  { %723 = vmatprep.mubr.msk.f32.mxu1 %vm815_vm0, %v814_v0  ;;  %692 = vmatpush3.msra.mxu1 %v343_v43 }
  0xdf   :  { %693 = vmatprep.subr.mxu1 %v814_v0 }
  0xe0   :  { %694 = vmatpush3.msra.mxu1 %v342_v44 }
  0xe1   :  { %695 = vmatprep.subr.mxu1 %v814_v0 }
  0xe2   :  { %696 = vmatpush3.msra.mxu1 %v341_v45 }
  0xe3   :  { %697 = vmatprep.subr.mxu1 %v814_v0 }
  0xe4   :  { %698 = vmatpush3.msra.mxu1 %v340_v46 }
  0xe5   :  { %699 = vmatprep.subr.mxu1 %v814_v0 }
  0xe6   :  { %700 = vmatpush3.msra.mxu1 %v339_v47 }
  0xe7   :  { %701 = vmatprep.subr.mxu1 %v814_v0 }
  0xe8   :  { %702 = vmatpush3.msra.mxu1 %v338_v48 }
  0xe9   :  { %703 = vmatprep.subr.mxu1 %v814_v0 }
  0xea   :  { %704 = vmatpush3.msra.mxu1 %v337_v49 }
  0xeb   :  { %705 = vmatprep.subr.mxu1 %v814_v0 }
  0xec   :  { %706 = vmatpush3.msra.mxu1 %v336_v50 }
  0xed   :  { %707 = vmatprep.subr.mxu1 %v814_v0 }
  0xee   :  { %708 = vmatpush3.msra.mxu1 %v335_v51 }
  0xef   :  { %709 = vmatprep.subr.mxu1 %v814_v0 }
  0xf0   :  { %710 = vmatpush3.msra.mxu1 %v334_v52 }
  0xf1   :  { %711 = vmatprep.subr.mxu1 %v814_v0 }
  0xf2   :  { %712 = vmatpush3.msra.mxu1 %v333_v53 }
  0xf3   :  { %713 = vmatprep.subr.mxu1 %v814_v0 }
  0xf4   :  { %714 = vmatpush3.msra.mxu1 %v332_v54 }
  0xf5   :  { %715 = vmatprep.subr.mxu1 %v814_v0 }
  0xf6   :  { %716 = vmatpush3.msra.mxu1 %v331_v55 }
  0xf7   :  { %717 = vmatprep.subr.mxu1 %v814_v0 }
  0xf8   :  { %718 = vmatpush3.msra.mxu1 %v330_v61 }
  0xf9   :  { %719 = vmatprep.subr.mxu1 %v814_v0 }
  0xfa   :  { %720 = vmatpush3.msra.mxu1 %v329_v62 }
  0xfb   :  { %721 = vmatprep.subr.mxu1 %v814_v0 }
  0xfc   :  { %722 = vmatpush3.msra.mxu1 %v328_v63 }
 0x19d   :  { %v229_v57 = vpop.f32.mrf.mxu1 }
 0x19e   :  { %v230_v58 = vadd.f32 %v533_v56, %v229_v57 }
 0x19f   :  { %v655_v59 = vpop.f32.mrf.mxu1 }
 0x1a0   :  { %v233_v60 = vmax.f32 %v230_v58, 0.0 }
 0x1a2   :  { %689 = vmatmul.mubr.f32.vlgmr.msra.gmra.mxu0 %v233_v60 }
 0x1a3   :  { %758 = vmatprep.mubr.msk.f32.mxu0 %vm815_vm0, %v814_v0  ;;  %727 = vmatpush3.msra.mxu0 %v437_v1 }
 0x1a4   :  { %728 = vmatprep.subr.mxu0 %v814_v0 }
 0x1a5   :  { %729 = vmatpush3.msra.mxu0 %v436_v2 }
 0x1a6   :  { %730 = vmatprep.subr.mxu0 %v814_v0 }
 0x1a7   :  { %731 = vmatpush3.msra.mxu0 %v435_v3 }
 0x1a8   :  { %732 = vmatprep.subr.mxu0 %v814_v0 }
 0x1a9   :  { %733 = vmatpush3.msra.mxu0 %v434_v4 }
 0x1aa   :  { %734 = vmatprep.subr.mxu0 %v814_v0 }
 0x1ab   :  { %735 = vmatpush3.msra.mxu0 %v433_v5 }
 0x1ac   :  { %736 = vmatprep.subr.mxu0 %v814_v0 }
 0x1ad   :  { %737 = vmatpush3.msra.mxu0 %v432_v6 }
 0x1ae   :  { %738 = vmatprep.subr.mxu0 %v814_v0 }
 0x1af   :  { %739 = vmatpush3.msra.mxu0 %v431_v7 }
 0x1b0   :  { %740 = vmatprep.subr.mxu0 %v814_v0 }
 0x1b1   :  { %741 = vmatpush3.msra.mxu0 %v430_v8 }
 0x1b2   :  { %742 = vmatprep.subr.mxu0 %v814_v0 }
 0x1b3   :  { %743 = vmatpush3.msra.mxu0 %v429_v9 }
 0x1b4   :  { %744 = vmatprep.subr.mxu0 %v814_v0 }
 0x1b5   :  { %745 = vmatpush3.msra.mxu0 %v428_v10 }
 0x1b6   :  { %746 = vmatprep.subr.mxu0 %v814_v0 }
 0x1b7   :  { %747 = vmatpush3.msra.mxu0 %v427_v11 }
 0x1b8   :  { %748 = vmatprep.subr.mxu0 %v814_v0 }
 0x1b9   :  { %749 = vmatpush3.msra.mxu0 %v426_v12 }
 0x1ba   :  { %750 = vmatprep.subr.mxu0 %v814_v0 }
 0x1bb   :  { %751 = vmatpush3.msra.mxu0 %v425_v13 }
 0x1bc   :  { %752 = vmatprep.subr.mxu0 %v814_v0 }
 0x1bd   :  { %753 = vmatpush3.msra.mxu0 %v424_v19 }
 0x1be   :  { %754 = vmatprep.subr.mxu0 %v814_v0 }
 0x1bf   :  { %755 = vmatpush3.msra.mxu0 %v423_v20 }
 0x1c0   :  { %756 = vmatprep.subr.mxu0 %v814_v0 }
 0x1c1   :  { %757 = vmatpush3.msra.mxu0 %v422_v21 }
 0x262   :  { %v323_v15 = vpop.f32.mrf.mxu0 }
 0x263   :  { %v324_v16 = vadd.f32 %v534_v14, %v323_v15 }
 0x264   :  { %v690_v17 = vpop.f32.mrf.mxu0 }
 0x265   :  { %v327_v18 = vmax.f32 %v324_v16, 0.0 }
 0x267   :  { %724 = vmatmul.mubr.f32.vlgmr.msra.gmra.mxu1 %v327_v18 }
 0x327   :  { %v417_v23 = vpop.f32.mrf.mxu1 }
 0x328   :  { %v418_v24 = vadd.f32 %v535_v22, %v417_v23 }
 0x329   :  { %v725_v25 = vpop.f32.mrf.mxu1 }
 0x32a   :  { %v421_v26 = vmax.f32 %v418_v24, 0.0 }
 0x32c   :  { %759 = vmatmul.mubr.f32.vlgmr.msra.gmra.mxu0 %v421_v26 }
 0x3ec   :  { %v511_v0 = vpop.f32.mrf.mxu0 }
 0x3ed   :  { %v512_v28 = vadd.f32 %v536_v27, %v511_v0 }
 0x3ee   :  { %v760_v29 = vpop.f32.mrf.mxu0 }
 0x3ef   :  { %515 = vst [vmem:[#allocation5] sm:$0xff] %v512_v28 }
 0x3f0   :  { %798 = shalt.err (!%p795_p9)
}
 0x3f1   :  { %525 = dma.vmem_to_hbm [thread:$0]  %s523_s23, 128, %s1182_s11, [#allocation4]  }
 0x3f2   :  { %809 = dma.done.wait [#allocation4], 128  }
 0x3f3   :  { %810 = vsyncadd [#allocation4], 4294967168 }
 0x3f4   :  { %529 = vsyncpa [#allocation3], 1 }
 0x3f5   :  { %530 = vsyncpa [#allocation4], 1 }

</bundles_post_ra>
